<compile_context>
chip_gen: v6e
topology: v6e:2x2x1
jax: 0.10.0
libtpu: 0.0.40
codegen_flags: <defaults>
</compile_context>

<pallas_src>
import math
import jax
import jax.numpy as jnp
from jax import lax
from jax.experimental import pallas as pl
from jax.experimental.pallas import tpu as pltpu

WINDOW_SIZE = 11
PAD = WINDOW_SIZE // 2
SIGMA = 1.5
C1 = 0.01 ** 2
C2 = 0.03 ** 2


def _gaussian_weights(window_size: int, sigma: float):
    g = [math.exp(-((x - window_size // 2) ** 2) / (2.0 * sigma ** 2))
         for x in range(window_size)]
    s = sum(g)
    return [v / s for v in g]  # python floats -> compile-time constants


_G1D = _gaussian_weights(WINDOW_SIZE, SIGMA)


def _banded_gaussian(n: int) -> jnp.ndarray:
    """(n, n) banded matrix M with M[i, j] = g[j - i + PAD].

    The zero-padding of the reference conv (padding=PAD) is folded into the
    truncated band at the edges, so it acts directly on the UNPADDED signal.
    Symmetric because the Gaussian taps are symmetric, so it is valid both as
    a left (row/H) operator and as a right (column/W) operator.
    """
    rows = []
    for i in range(n):
        rows.append([_G1D[j - i + PAD] if 0 <= j - i + PAD < WINDOW_SIZE else 0.0
                     for j in range(n)])
    return jnp.asarray(rows, jnp.float32)


def _make_ssim_kernel(ch: int):
    def kernel(gh_ref, gw_ref, i1_ref, i2_ref, out_ref):
        x1 = i1_ref[0].astype(jnp.float32)      # (C*H, W)
        x2 = i2_ref[0].astype(jnp.float32)
        gh = gh_ref[...]                        # (C*H, C*H) block-diag banded
        gw = gw_ref[...]                        # (W, W) banded (symmetric)

        # Row (H) pass: dense (CH, CH) matmuls on the MXU, one per field.
        fields = (x1, x2, x1 * x1, x2 * x2, x1 * x2)
        t = [jnp.dot(gh, f, preferred_element_type=jnp.float32) for f in fields]

        # Column (W) pass: batch the 5 fields along the sublane axis so the
        # small-K (K = W) matmul is issued once instead of five times.
        stacked = jnp.concatenate(t, axis=0)                       # (5*CH, W)
        m = jnp.dot(stacked, gw, preferred_element_type=jnp.float32)

        # Sublane-aligned static slices (offsets are multiples of CH).
        mu1 = m[0 * ch:1 * ch]
        mu2 = m[1 * ch:2 * ch]
        s11 = m[2 * ch:3 * ch]
        s22 = m[3 * ch:4 * ch]
        s12 = m[4 * ch:5 * ch]

        mu1_sq = mu1 * mu1
        mu2_sq = mu2 * mu2
        mu1_mu2 = mu1 * mu2
        sigma1_sq = s11 - mu1_sq
        sigma2_sq = s22 - mu2_sq
        sigma12 = s12 - mu1_mu2

        num = (2.0 * mu1_mu2 + C1) * (2.0 * sigma12 + C2)
        den = (mu1_sq + mu2_sq + C1) * (sigma1_sq + sigma2_sq + C2)
        # exact reciprocal (EUP + refinement) to stay within the 1e-4 tolerance
        ssim_map = num * pl.reciprocal(den, approx=False)

        # per-batch partial sum, broadcast into a lane-dense (1, 1, 128) block
        out_ref[...] = jnp.broadcast_to(jnp.sum(ssim_map), out_ref.shape)

    return kernel


def ssim_pallas(img1: jax.Array, img2: jax.Array) -> jax.Array:
    """SSIM (size_average=True) of two NCHW images. Returns a scalar."""
    assert img1.shape == img2.shape
    B, C, H, W = img1.shape
    CH = C * H

    # free (metadata-only) reshape: fuse channels into the sublane axis
    i1r = img1.reshape(B, CH, W)
    i2r = img2.reshape(B, CH, W)

    gh = jnp.kron(jnp.eye(C, dtype=jnp.float32), _banded_gaussian(H))  # (C*H, C*H)
    gw = _banded_gaussian(W)                                           # (W, W)

    # working set: 2 inputs x double-buffer + G matrices + ~18 field-sized temps
    elem = CH * W * 4
    need = 2 * 2 * elem + (CH * CH + W * W) * 4 + 18 * elem
    vmem_limit = int(min(max(4 * need, 16 * 1024 * 1024), 32 * 1024 * 1024))

    # TODO(synk): for large images (e.g. 1080p on v7x's 64 MiB VMEM) tile H into
    # strips with a 2*PAD halo instead of one full (C*H, W) slab per batch.
    kernel = _make_ssim_kernel(CH)
    partial = pl.pallas_call(
        kernel,
        out_shape=jax.ShapeDtypeStruct((B, 1, 128), jnp.float32),
        grid=(B,),
        in_specs=[
            pl.BlockSpec((CH, CH), lambda b: (0, 0)),
            pl.BlockSpec((W, W), lambda b: (0, 0)),
            pl.BlockSpec((1, CH, W), lambda b: (b, 0, 0)),
            pl.BlockSpec((1, CH, W), lambda b: (b, 0, 0)),
        ],
        out_specs=pl.BlockSpec((1, 1, 128), lambda b: (b, 0, 0)),
        compiler_params=pltpu.CompilerParams(
            dimension_semantics=("parallel",),
            vmem_limit_bytes=vmem_limit),
    )(gh, gw, i1r, i2r)

    return jnp.sum(partial[:, 0, 0]) / jnp.float32(B * C * H * W)


def _ssim_reference(img1, img2):
    """Pure-JAX reference matching the PyTorch _ssim (groups=channel conv)."""
    B, C, H, W = img1.shape
    g = jnp.asarray(_G1D, jnp.float32)
    win2d = jnp.outer(g, g)                          # (11, 11)
    kern = jnp.broadcast_to(win2d, (C, 1, WINDOW_SIZE, WINDOW_SIZE))

    def conv(x):
        return lax.conv_general_dilated(
            x, kern, window_strides=(1, 1),
            padding=((PAD, PAD), (PAD, PAD)),
            dimension_numbers=("NCHW", "OIHW", "NCHW"),
            feature_group_count=C)

    mu1, mu2 = conv(img1), conv(img2)
    mu1_sq, mu2_sq, mu1_mu2 = mu1 * mu1, mu2 * mu2, mu1 * mu2
    s1 = conv(img1 * img1) - mu1_sq
    s2 = conv(img2 * img2) - mu2_sq
    s12 = conv(img1 * img2) - mu1_mu2
    ssim_map = ((2 * mu1_mu2 + C1) * (2 * s12 + C2)) / (
        (mu1_sq + mu2_sq + C1) * (s1 + s2 + C2))
    return jnp.mean(ssim_map)


if __name__ == "__main__":
    key = jax.random.PRNGKey(0)
    k1, k2 = jax.random.split(key)
    B, C, H, W = 2, 4, 16, 16
    img1 = jax.random.uniform(k1, (B, C, H, W), dtype=jnp.float32)
    img2 = jax.random.uniform(k2, (B, C, H, W), dtype=jnp.float32)

    result = jax.block_until_ready(ssim_pallas(img1, img2))
    ref = jax.block_until_ready(_ssim_reference(img1, img2))

    assert jnp.isfinite(result), "non-finite SSIM"
    assert abs(float(result) - float(ref)) < 1e-4, (float(result), float(ref))
    print("KERNEL_OK")
</pallas_src>

<mosaic_0001>
module attributes {stable_mosaic.version = 11 : i64} {
  func.func @kernel(%arg0: i32, %arg1: memref<64x64xf32, #tpu.memory_space<vmem>>, %arg2: memref<16x16xf32, #tpu.memory_space<vmem>>, %arg3: memref<1x64x16xf32, #tpu.memory_space<vmem>>, %arg4: memref<1x64x16xf32, #tpu.memory_space<vmem>>, %arg5: memref<1x1x128xf32, #tpu.memory_space<vmem>>) attributes {dimension_semantics = [#tpu.dimension_semantics<parallel>], iteration_bounds = array<i64: 2>, scalar_prefetch = 0 : i64, scratch_operands = 0 : i64, tpu.core_type = #tpu.core_type<tc>, window_params = [{pipeline_mode = #tpu.pipeline_mode<synchronous>, transform_indices = @transform_0, window_bounds = array<i64: 64, 64>}, {pipeline_mode = #tpu.pipeline_mode<synchronous>, transform_indices = @transform_1, window_bounds = array<i64: 16, 16>}, {transform_indices = @transform_2, window_bounds = array<i64: 1, 64, 16>}, {transform_indices = @transform_3, window_bounds = array<i64: 1, 64, 16>}, {transform_indices = @transform_4, window_bounds = array<i64: 1, 1, 128>}]} {
    %c0 = arith.constant 0 : index
    %c0_0 = arith.constant 0 : index
    %c0_1 = arith.constant 0 : index
    %0 = vector.load %arg3[%c0, %c0_0, %c0_1] : memref<1x64x16xf32, #tpu.memory_space<vmem>>, vector<1x64x16xf32>
    %1 = vector.shape_cast %0 : vector<1x64x16xf32> to vector<64x16xf32>
    %c0_2 = arith.constant 0 : index
    %c0_3 = arith.constant 0 : index
    %c0_4 = arith.constant 0 : index
    %2 = vector.load %arg4[%c0_2, %c0_3, %c0_4] : memref<1x64x16xf32, #tpu.memory_space<vmem>>, vector<1x64x16xf32>
    %3 = vector.shape_cast %2 : vector<1x64x16xf32> to vector<64x16xf32>
    %c0_5 = arith.constant 0 : index
    %c0_6 = arith.constant 0 : index
    %4 = vector.load %arg1[%c0_5, %c0_6] : memref<64x64xf32, #tpu.memory_space<vmem>>, vector<64x64xf32>
    %c0_7 = arith.constant 0 : index
    %c0_8 = arith.constant 0 : index
    %5 = vector.load %arg2[%c0_7, %c0_8] : memref<16x16xf32, #tpu.memory_space<vmem>>, vector<16x16xf32>
    %6 = arith.mulf %1, %1 : vector<64x16xf32>
    %7 = arith.mulf %3, %3 : vector<64x16xf32>
    %8 = arith.mulf %1, %3 : vector<64x16xf32>
    %cst = arith.constant dense<0.000000e+00> : vector<64x16xf32>
    %9 = tpu.matmul %4, %1, %cst {dimension_numbers = #tpu.dot_dimension_numbers<[1], [0], [0], [1], [0, 0, 1, 1], [], []>} : vector<64x64xf32>, vector<64x16xf32>, vector<64x16xf32> -> vector<64x16xf32>
    %cst_9 = arith.constant dense<0.000000e+00> : vector<64x16xf32>
    %10 = tpu.matmul %4, %3, %cst_9 {dimension_numbers = #tpu.dot_dimension_numbers<[1], [0], [0], [1], [0, 0, 1, 1], [], []>} : vector<64x64xf32>, vector<64x16xf32>, vector<64x16xf32> -> vector<64x16xf32>
    %cst_10 = arith.constant dense<0.000000e+00> : vector<64x16xf32>
    %11 = tpu.matmul %4, %6, %cst_10 {dimension_numbers = #tpu.dot_dimension_numbers<[1], [0], [0], [1], [0, 0, 1, 1], [], []>} : vector<64x64xf32>, vector<64x16xf32>, vector<64x16xf32> -> vector<64x16xf32>
    %cst_11 = arith.constant dense<0.000000e+00> : vector<64x16xf32>
    %12 = tpu.matmul %4, %7, %cst_11 {dimension_numbers = #tpu.dot_dimension_numbers<[1], [0], [0], [1], [0, 0, 1, 1], [], []>} : vector<64x64xf32>, vector<64x16xf32>, vector<64x16xf32> -> vector<64x16xf32>
    %cst_12 = arith.constant dense<0.000000e+00> : vector<64x16xf32>
    %13 = tpu.matmul %4, %8, %cst_12 {dimension_numbers = #tpu.dot_dimension_numbers<[1], [0], [0], [1], [0, 0, 1, 1], [], []>} : vector<64x64xf32>, vector<64x16xf32>, vector<64x16xf32> -> vector<64x16xf32>
    %14 = tpu.concatenate %9, %10, %11, %12, %13 in 0 : vector<64x16xf32>, vector<64x16xf32>, vector<64x16xf32>, vector<64x16xf32>, vector<64x16xf32> -> vector<320x16xf32>
    %cst_13 = arith.constant dense<0.000000e+00> : vector<320x16xf32>
    %15 = tpu.matmul %14, %5, %cst_13 {dimension_numbers = #tpu.dot_dimension_numbers<[1], [0], [0], [1], [0, 0, 1, 1], [], []>} : vector<320x16xf32>, vector<16x16xf32>, vector<320x16xf32> -> vector<320x16xf32>
    %16 = vector.extract_strided_slice %15 {offsets = [0, 0], sizes = [64, 16], strides = [1, 1]} : vector<320x16xf32> to vector<64x16xf32>
    %17 = vector.extract_strided_slice %15 {offsets = [64, 0], sizes = [64, 16], strides = [1, 1]} : vector<320x16xf32> to vector<64x16xf32>
    %18 = vector.extract_strided_slice %15 {offsets = [128, 0], sizes = [64, 16], strides = [1, 1]} : vector<320x16xf32> to vector<64x16xf32>
    %19 = vector.extract_strided_slice %15 {offsets = [192, 0], sizes = [64, 16], strides = [1, 1]} : vector<320x16xf32> to vector<64x16xf32>
    %20 = vector.extract_strided_slice %15 {offsets = [256, 0], sizes = [64, 16], strides = [1, 1]} : vector<320x16xf32> to vector<64x16xf32>
    %21 = arith.mulf %16, %16 : vector<64x16xf32>
    %22 = arith.mulf %17, %17 : vector<64x16xf32>
    %23 = arith.mulf %16, %17 : vector<64x16xf32>
    %24 = arith.subf %18, %21 : vector<64x16xf32>
    %25 = arith.subf %19, %22 : vector<64x16xf32>
    %26 = arith.subf %20, %23 : vector<64x16xf32>
    %cst_14 = arith.constant 2.000000e+00 : f32
    %27 = vector.broadcast %cst_14 : f32 to vector<64x16xf32>
    %28 = arith.mulf %27, %23 : vector<64x16xf32>
    %cst_15 = arith.constant 9.99999974E-5 : f32
    %29 = vector.broadcast %cst_15 : f32 to vector<64x16xf32>
    %30 = arith.addf %28, %29 : vector<64x16xf32>
    %cst_16 = arith.constant 2.000000e+00 : f32
    %31 = vector.broadcast %cst_16 : f32 to vector<64x16xf32>
    %32 = arith.mulf %31, %26 : vector<64x16xf32>
    %cst_17 = arith.constant 8.99999984E-4 : f32
    %33 = vector.broadcast %cst_17 : f32 to vector<64x16xf32>
    %34 = arith.addf %32, %33 : vector<64x16xf32>
    %35 = arith.mulf %30, %34 : vector<64x16xf32>
    %36 = arith.addf %21, %22 : vector<64x16xf32>
    %cst_18 = arith.constant 9.99999974E-5 : f32
    %37 = vector.broadcast %cst_18 : f32 to vector<64x16xf32>
    %38 = arith.addf %36, %37 : vector<64x16xf32>
    %39 = arith.addf %24, %25 : vector<64x16xf32>
    %cst_19 = arith.constant 8.99999984E-4 : f32
    %40 = vector.broadcast %cst_19 : f32 to vector<64x16xf32>
    %41 = arith.addf %39, %40 : vector<64x16xf32>
    %42 = arith.mulf %38, %41 : vector<64x16xf32>
    %43 = tpu.reciprocal %42 : vector<64x16xf32> -> vector<64x16xf32>
    %44 = arith.mulf %35, %43 : vector<64x16xf32>
    %45 = vector.shape_cast %44 : vector<64x16xf32> to vector<1x64x16xf32>
    %cst_20 = arith.constant dense<0.000000e+00> : vector<1xf32>
    %46 = vector.multi_reduction <add>, %45, %cst_20 [1, 2] : vector<1x64x16xf32> to vector<1xf32>
    %47 = vector.shape_cast %46 : vector<1xf32> to vector<1x1x1xf32>
    %48 = vector.extract %47[0, 0, 0] : f32 from vector<1x1x1xf32>
    %49 = vector.broadcast %48 : f32 to vector<1x1x128xf32>
    %c0_21 = arith.constant 0 : index
    %c0_22 = arith.constant 0 : index
    %c0_23 = arith.constant 0 : index
    %50 = vector.load %arg5[%c0_21, %c0_22, %c0_23] : memref<1x1x128xf32, #tpu.memory_space<vmem>>, vector<1x1x128xf32>
    tpu.vector_store %arg5[%c0_21, %c0_22, %c0_23], %49 {strides = array<i32>} : memref<1x1x128xf32, #tpu.memory_space<vmem>>, vector<1x1x128xf32>,
    return
  }
  func.func @transform_0(%arg0: i32) -> (i32, i32) {
    %c0_i32 = arith.constant 0 : i32
    %c0_i32_0 = arith.constant 0 : i32
    %c0_i32_1 = arith.constant 0 : i32
    return %c0_i32, %c0_i32_0 : i32, i32
  }
  func.func @transform_1(%arg0: i32) -> (i32, i32) {
    %c0_i32 = arith.constant 0 : i32
    %c0_i32_0 = arith.constant 0 : i32
    %c0_i32_1 = arith.constant 0 : i32
    return %c0_i32, %c0_i32_0 : i32, i32
  }
  func.func @transform_2(%arg0: i32) -> (i32, i32, i32) {
    %c0_i32 = arith.constant 0 : i32
    %c0_i32_0 = arith.constant 0 : i32
    %c0_i32_1 = arith.constant 0 : i32
    return %arg0, %c0_i32, %c0_i32_0 : i32, i32, i32
  }
  func.func @transform_3(%arg0: i32) -> (i32, i32, i32) {
    %c0_i32 = arith.constant 0 : i32
    %c0_i32_0 = arith.constant 0 : i32
    %c0_i32_1 = arith.constant 0 : i32
    return %arg0, %c0_i32, %c0_i32_0 : i32, i32, i32
  }
  func.func @transform_4(%arg0: i32) -> (i32, i32, i32) {
    %c0_i32 = arith.constant 0 : i32
    %c0_i32_0 = arith.constant 0 : i32
    %c0_i32_1 = arith.constant 0 : i32
    return %arg0, %c0_i32, %c0_i32_0 : i32, i32, i32
  }
}

</mosaic_0001>

<bundles_post_ra>
// kernel: tpu_custom_call.1
= control target key start
LH: loop header
LB: loop body
LE: loop exit
PB: predicated region body
PF: predicated region fallthrough
CT: control target
= control target key end

     0   :  { %9 = vsyncpa [#allocation3], 0  ;;  %s2508_s0 = inlined_call_operand.vmem [shape: f32[64,64], index: 0, kind: input, shape index: {}]   ;;  %s2509_s1 = inlined_call_operand.vmem [shape: f32[16,16], index: 1, kind: input, shape index: {}]   ;;  %s2510_s2 = inlined_call_operand.vmem [shape: f32[2,64,16], index: 2, kind: input, shape index: {}]   ;;  %s2511_s3 = inlined_call_operand.vmem [shape: f32[2,64,16], index: 3, kind: input, shape index: {}]   ;;  %s2512_s4 = inlined_call_operand.hbm [shape: f32[2,1,128], index: 4, kind: output, shape index: {}]  }
   0x1   :  { %11 = vsyncpa [#allocation3 + $0x1], 0  ;;  %s2019_s15 = smov 0   ;;  %s2021_s16 = smov 0  }
   0x2   :  { %s2023_s17 = smov 0   ;;  %s2025_s18 = smov 0  }
   0x3 LB: > { %s2040_s19 = sadd.s32 4294967295, %s1991_s18   ;;  %s1451_s20 = sadd.s32 4294967294, %s1991_s18   ;;  %s1991_s18 = sphi %s2025_s18, %s2518_s18   ;;  %s1987_s17 = sphi %s2023_s17, %s2517_s17   ;;  %s1983_s16 = sphi %s2021_s16, %s2516_s16   ;;  %s1979_s15 = sphi %s2019_s15, %s2515_s15  }
   0x4   : > { %s2044_s21 = sadd.s32 1, %s1991_s18   ;;  %s118_s22 = sadd.s32 1, %s1987_s17 }
   0x5   : > { %s115_s23 = ssub.s32 %s1991_s18, %s2044_s21  ;;  %p128_p0 = scmp.ne.s32.totalorder %s1987_s17, %s1983_s16 }
   0x6   : > { %p116_p1 = scmp.eq.s32.totalorder %s115_s23, 0  ;;  %p129_p2 = scmp.eq.s32.totalorder %s2040_s19, 1 }
   0x7   : > { %p134_p3 = scmp.ne.s32.totalorder %s1983_s16, %s1979_s15  ;;  %p135_p4 = scmp.eq.s32.totalorder %s1451_s20, 1 }
   0x8   : > { %s2055_s24 = scalar_select %p116_p1, %s1987_s17, %s118_s22  }
   0x9   : > { %p2057_p5 = por %p129_p2, %p128_p0  ;;  %p2061_p6 = por %p135_p4, %p134_p3 }
   0xa   : > { %p1454_p7 = scmp.ge.s32.totalorder %s1991_s18, 1  ;;  %p175_p8 = scmp.lt.s32.totalorder %s1991_s18, 3 }
   0xc   : > { %p176_p9 = pnand %p1454_p7, %p175_p8 }
   0xd   : > { %p205_p10 = scmp.lt.s32.totalorder (!%p176_p9), %s2040_s19, 1  ;;  %s203_s12 = sand.u32 (!%p176_p9), 1, %s1983_s16  }
   0xe   : > { %179 = sbr.rel (%p176_p9) target bundleno = 721 (0x2d1), region = 36  ;;  %s204_s13 = scalar_lea.vmem (!%p176_p9), [#allocation2], %s203_s12 }
   0xf   : > { %s1384_s14 = sshll.u32 (!%p176_p9), %s204_s13, 4  ;;  %s1539_s20 = sshll.u32 (!%p176_p9), %s2040_s19, 4  ;;  %s2470_s14 = int_to_ptr.vmem [resolvable:$true] %s1384_s14 }
  0x10   : > { %s1382_s28 = scalar_lea.hbm (!%p176_p9), %s2512_s4, %s1539_s20  ;;  %s1993_s5 = smov (!%p176_p9), [#allocation2]  }
  0x13   : > { %v2071_v0 = vld [vmem:[%s2508_s0] sm:$0xff]  ;;  %vm265_vm0 = vcmask 523264   ;;  %s206_s29 = scalar_select %p205_p10, %s2040_s19, 1  ;;  %v2163_v17 = vld [vmem:[%s2508_s0 + $0x8] sm:$0xff]  ;;  %v2172_v19 = vld [vmem:[%s2508_s0 + $0x10] sm:$0xff]  ;;  %vm815_vm1 = vcmask 130048  }
  0x14   : > { %1682 = vmatprep.mubr.msk.f32.mxu0 %vm265_vm0, %v2071_v0  ;;  %1710 = vmatprep.mubr.msk.f32.mxu1 %vm265_vm0, %v2071_v0  ;;  %v2189_v22 = vld [vmem:[%s2508_s0 + $0x18] sm:$0xff]  ;;  %v2196_v24 = vld [vmem:[%s2508_s0 + $0x20] sm:$0xff]  ;;  %v2211_v27 = vld [vmem:[%s2508_s0 + $0x28] sm:$0xff]  ;;  %s1935_s19 = sshll.u32 %s1993_s5, 4  ;;  %s1936_s19 = int_to_ptr.vmem [resolvable:$false] %s1935_s19 }
  0x15   : > { %s1542_s30 = sshll.u32 %s206_s29, 6  ;;  %v2218_v29 = vld [vmem:[%s2508_s0 + $0x30] sm:$0xff]  ;;  %v2233_v32 = vld [vmem:[%s2508_s0 + $0x38] sm:$0xff]  ;;  %v240_v48 = vld [vmem:[%s2509_s1 + $0x8] sm:$0xff]  ;;  %s1372_s29 = scalar_lea.sflag [#allocation3], %s203_s12 }
  0x16   : > { %s2081_s7 = scalar_lea.vmem %s2510_s2, %s1542_s30  ;;  %s2086_s10 = scalar_lea.vmem %s2511_s3, %s1542_s30  ;;  %v239_v49 = vld [vmem:[%s2509_s1] sm:$0xff] }
  0x17   : > { %v2089_v1 = vld [vmem:[%s2081_s7 + $0x38] sm:$0xff]  ;;  %v2092_v2 = vld [vmem:[%s2081_s7 + $0x30] sm:$0xff]  ;;  %v2097_v3 = vld [vmem:[%s2081_s7 + $0x28] sm:$0xff]  ;;  %s1931_s30 = scalar_lea.vmem %s2470_s14, 16  ;;  %s1937_s6 = scalar_lea.vmem %s1936_s19, 32 }
  0x18   : > { %1666 = vmatprep.subr.mxu0 %v2089_v1  ;;  %v2100_v4 = vld [vmem:[%s2086_s10 + $0x38] sm:$0xff]  ;;  %v2105_v5 = vld [vmem:[%s2086_s10 + $0x30] sm:$0xff]  ;;  %v2109_v6 = vld [vmem:[%s2081_s7 + $0x20] sm:$0xff]  ;;  %v248_v16 = vmul.f32 %v2089_v1, %v2089_v1  ;;  %v247_v18 = vmul.f32 %v2092_v2, %v2092_v2  ;;  %v246_v21 = vmul.f32 %v2097_v3, %v2097_v3  ;;  %p1932_p11 = scmp.ne.s32.totalorder %s2470_s14, %s1931_s30  ;;  %p1938_p0 = scmp.lt.s32.totalorder %s2470_s14, %s1936_s19 }
  0x19   : > { %1667 = vmatpush3.msra.mxu0 %v2089_v1  ;;  %1694 = vmatprep.subr.mxu1 %v2100_v4  ;;  %v2113_v7 = vld [vmem:[%s2086_s10 + $0x28] sm:$0xff]  ;;  %v2119_v8 = vld [vmem:[%s2081_s7 + $0x18] sm:$0xff]  ;;  %v2123_v9 = vld [vmem:[%s2086_s10 + $0x20] sm:$0xff]  ;;  %v245_v23 = vmul.f32 %v2109_v6, %v2109_v6  ;;  %v256_v25 = vmul.f32 %v2100_v4, %v2100_v4  ;;  %v255_v30 = vmul.f32 %v2105_v5, %v2105_v5  ;;  %p1939_p1 = scmp.lt.s32.totalorder %s1937_s6, %s1931_s30 }
  0x1a   : > { %1668 = vmatprep.subr.mxu0 %v2092_v2  ;;  %1695 = vmatpush3.msra.mxu1 %v2100_v4  ;;  %v2129_v10 = vld [vmem:[%s2081_s7 + $0x10] sm:$0xff]  ;;  %v2133_v11 = vld [vmem:[%s2086_s10 + $0x18] sm:$0xff]  ;;  %v2139_v12 = vld [vmem:[%s2081_s7 + $0x8] sm:$0xff]  ;;  %v244_v26 = vmul.f32 %v2119_v8, %v2119_v8  ;;  %v254_v34 = vmul.f32 %v2113_v7, %v2113_v7  ;;  %v253_v35 = vmul.f32 %v2123_v9, %v2123_v9  ;;  %p1933_p12 = pnand %p1932_p11, %p2057_p5 }
  0x1b   : > { %1669 = vmatpush3.msra.mxu0 %v2092_v2  ;;  %1696 = vmatprep.subr.mxu1 %v2105_v5  ;;  %v2143_v13 = vld [vmem:[%s2086_s10 + $0x10] sm:$0xff]  ;;  %v2149_v14 = vld [vmem:[%s2081_s7] sm:$0xff]  ;;  %v2153_v15 = vld [vmem:[%s2086_s10 + $0x8] sm:$0xff]  ;;  %v243_v28 = vmul.f32 %v2129_v10, %v2129_v10  ;;  %v242_v31 = vmul.f32 %v2139_v12, %v2139_v12  ;;  %v264_v36 = vmul.f32 %v2100_v4, %v2089_v1  ;;  %p1940_p2 = por %p1939_p1, %p1938_p0 }
  0x1c   : > { %1670 = vmatprep.subr.mxu0 %v2097_v3  ;;  %1697 = vmatpush3.msra.mxu1 %v2105_v5  ;;  %v2178_v20 = vld [vmem:[%s2086_s10] sm:$0xff]  ;;  %v241_v33 = vmul.f32 %v2149_v14, %v2149_v14  ;;  %v252_v37 = vmul.f32 %v2133_v11, %v2133_v11  ;;  %v251_v38 = vmul.f32 %v2143_v13, %v2143_v13  ;;  %p1934_p13 = pneg %p1933_p12 }
  0x1d   : > { %1671 = vmatpush3.msra.mxu0 %v2097_v3  ;;  %1698 = vmatprep.subr.mxu1 %v2113_v7  ;;  %v250_v39 = vmul.f32 %v2153_v15, %v2153_v15  ;;  %v249_v40 = vmul.f32 %v2178_v20, %v2178_v20  ;;  %v263_v41 = vmul.f32 %v2105_v5, %v2092_v2 }
  0x1e   : > { %1672 = vmatprep.subr.mxu0 %v2109_v6  ;;  %1699 = vmatpush3.msra.mxu1 %v2113_v7  ;;  %v262_v42 = vmul.f32 %v2113_v7, %v2097_v3  ;;  %v261_v43 = vmul.f32 %v2123_v9, %v2109_v6  ;;  %v260_v44 = vmul.f32 %v2133_v11, %v2119_v8  ;;  %p1941_p3 = pnand %p1940_p2, %p1934_p13 }
  0x1f   : > { %1673 = vmatpush3.msra.mxu0 %v2109_v6  ;;  %1700 = vmatprep.subr.mxu1 %v2123_v9  ;;  %v259_v45 = vmul.f32 %v2143_v13, %v2129_v10  ;;  %v258_v46 = vmul.f32 %v2153_v15, %v2139_v12  ;;  %v257_v47 = vmul.f32 %v2178_v20, %v2149_v14 }
  0x20   : > { %1674 = vmatprep.subr.mxu0 %v2119_v8  ;;  %1701 = vmatpush3.msra.mxu1 %v2123_v9 }
  0x21   : > { %1675 = vmatpush3.msra.mxu0 %v2119_v8  ;;  %1702 = vmatprep.subr.mxu1 %v2133_v11 }
  0x22   : > { %1676 = vmatprep.subr.mxu0 %v2129_v10  ;;  %1703 = vmatpush3.msra.mxu1 %v2133_v11 }
  0x23   : > { %1677 = vmatpush3.msra.mxu0 %v2129_v10  ;;  %1704 = vmatprep.subr.mxu1 %v2143_v13 }
  0x24   : > { %1678 = vmatprep.subr.mxu0 %v2139_v12  ;;  %1705 = vmatpush3.msra.mxu1 %v2143_v13 }
  0x25   : > { %1679 = vmatpush3.msra.mxu0 %v2139_v12  ;;  %1706 = vmatprep.subr.mxu1 %v2153_v15 }
  0x26   : > { %1680 = vmatprep.subr.mxu0 %v2149_v14  ;;  %1707 = vmatpush3.msra.mxu1 %v2153_v15 }
  0x27   : > { %1681 = vmatpush3.msra.mxu0 %v2149_v14  ;;  %1708 = vmatprep.subr.mxu1 %v2178_v20 }
  0x28   : > { %1683 = vmatmul.mubr.msk.f32.vlgmr.msra.gmra.mxu0 %vm265_vm0, %v2163_v17  ;;  %1722 = vmatprep.subr.mxu0 %v248_v16 }
  0x29   : > { %1723 = vmatpush3.msra.mxu0 %v248_v16  ;;  %1685 = vmatprep.mubr.msk.f32.mxu0 %vm265_vm0, %v2172_v19 }
  0x2a   : > { %1724 = vmatprep.subr.mxu0 %v247_v18  ;;  %1709 = vmatpush3.msra.mxu1 %v2178_v20 }
  0x2b   : > { %1725 = vmatpush3.msra.mxu0 %v247_v18  ;;  %1711 = vmatmul.mubr.msk.f32.vlgmr.msra.gmra.mxu1 %vm265_vm0, %v2163_v17 }
  0x2c   : > { %1686 = vmatmul.mubr.msk.f32.gmra.mxu0 %vm265_vm0, %v2189_v22  ;;  %1726 = vmatprep.subr.mxu0 %v246_v21 }
  0x2d   : > { %1727 = vmatpush3.msra.mxu0 %v246_v21  ;;  %1688 = vmatprep.mubr.msk.f32.mxu0 %vm265_vm0, %v2196_v24 }
  0x2e   : > { %1728 = vmatprep.subr.mxu0 %v245_v23  ;;  %1750 = vmatprep.subr.mxu1 %v256_v25 }
  0x2f   : > { %1729 = vmatpush3.msra.mxu0 %v245_v23  ;;  %1751 = vmatpush3.msra.mxu1 %v256_v25 }
  0x30   : > { %1689 = vmatmul.mubr.msk.f32.gmra.mxu0 %vm265_vm0, %v2211_v27  ;;  %1730 = vmatprep.subr.mxu0 %v244_v26 }
  0x31   : > { %1731 = vmatpush3.msra.mxu0 %v244_v26  ;;  %1691 = vmatprep.mubr.msk.f32.mxu0 %vm265_vm0, %v2218_v29 }
  0x32   : > { %1732 = vmatprep.subr.mxu0 %v243_v28  ;;  %1752 = vmatprep.subr.mxu1 %v255_v30 }
  0x33   : > { %1733 = vmatpush3.msra.mxu0 %v243_v28  ;;  %1713 = vmatprep.mubr.msk.f32.mxu1 %vm265_vm0, %v2172_v19 }
  0x34   : > { %1692 = vmatmul.mubr.msk.f32.gmra.mxu0 %vm265_vm0, %v2233_v32  ;;  %1734 = vmatprep.subr.mxu0 %v242_v31 }
  0x35   : > { %1735 = vmatpush3.msra.mxu0 %v242_v31  ;;  %1738 = vmatprep.mubr.msk.f32.mxu0 %vm265_vm0, %v2071_v0 }
  0x36   : > { %1736 = vmatprep.subr.mxu0 %v241_v33  ;;  %1753 = vmatpush3.msra.mxu1 %v255_v30 }
  0x37   : > { %1737 = vmatpush3.msra.mxu0 %v241_v33  ;;  %1714 = vmatmul.mubr.msk.f32.gmra.mxu1 %vm265_vm0, %v2189_v22 }
  0x38   : > { %1739 = vmatmul.mubr.msk.f32.vlgmr.msra.gmra.mxu0 %vm265_vm0, %v2163_v17  ;;  %1754 = vmatprep.subr.mxu1 %v254_v34 }
  0x39   : > { %1741 = vmatprep.mubr.msk.f32.mxu0 %vm265_vm0, %v2172_v19  ;;  %1755 = vmatpush3.msra.mxu1 %v254_v34 }
  0x3a   : > { %1716 = vmatprep.mubr.msk.f32.mxu1 %vm265_vm0, %v2196_v24  ;;  %1756 = vmatprep.subr.mxu1 %v253_v35 }
  0x3b   : > { %1778 = vmatprep.subr.mxu0 %v264_v36  ;;  %1757 = vmatpush3.msra.mxu1 %v253_v35 }
  0x3c   : > { %1742 = vmatmul.mubr.msk.f32.gmra.mxu0 %vm265_vm0, %v2189_v22  ;;  %1717 = vmatmul.mubr.msk.f32.gmra.mxu1 %vm265_vm0, %v2211_v27 }
  0x3d   : > { %1744 = vmatprep.mubr.msk.f32.mxu0 %vm265_vm0, %v2196_v24  ;;  %1758 = vmatprep.subr.mxu1 %v252_v37 }
  0x3e   : > { %1719 = vmatprep.mubr.msk.f32.mxu1 %vm265_vm0, %v2218_v29  ;;  %1759 = vmatpush3.msra.mxu1 %v252_v37 }
  0x3f   : > { %1779 = vmatpush3.msra.mxu0 %v264_v36  ;;  %1760 = vmatprep.subr.mxu1 %v251_v38 }
  0x40   : > { %1745 = vmatmul.mubr.msk.f32.gmra.mxu0 %vm265_vm0, %v2211_v27  ;;  %1761 = vmatpush3.msra.mxu1 %v251_v38 }
  0x41   : > { %1747 = vmatprep.mubr.msk.f32.mxu0 %vm265_vm0, %v2218_v29  ;;  %1720 = vmatmul.mubr.msk.f32.gmra.mxu1 %vm265_vm0, %v2233_v32 }
  0x42   : > { %1762 = vmatprep.subr.mxu1 %v250_v39  ;;  %1766 = vmatprep.mubr.msk.f32.mxu1 %vm265_vm0, %v2071_v0 }
  0x43   : > { %1763 = vmatpush3.msra.mxu1 %v250_v39  ;;  %1780 = vmatprep.subr.mxu0 %v263_v41 }
  0x44   : > { %1748 = vmatmul.mubr.msk.f32.gmra.mxu0 %vm265_vm0, %v2233_v32  ;;  %1764 = vmatprep.subr.mxu1 %v249_v40 }
  0x45   : > { %1765 = vmatpush3.msra.mxu1 %v249_v40  ;;  %1781 = vmatpush3.msra.mxu0 %v263_v41 }
  0x46   : > { %1767 = vmatmul.mubr.msk.f32.vlgmr.msra.gmra.mxu1 %vm265_vm0, %v2163_v17  ;;  %1782 = vmatprep.subr.mxu0 %v262_v42 }
  0x47   : > { %1769 = vmatprep.mubr.msk.f32.mxu1 %vm265_vm0, %v2172_v19  ;;  %1783 = vmatpush3.msra.mxu0 %v262_v42 }
  0x48   : > { %1794 = vmatprep.mubr.msk.f32.mxu0 %vm265_vm0, %v2071_v0  ;;  %1784 = vmatprep.subr.mxu0 %v261_v43 }
  0x49   : > { %1785 = vmatpush3.msra.mxu0 %v261_v43  ;;  %1870 = vmatprep.subr.mxu1 %v240_v48 }
  0x4a   : > { %1770 = vmatmul.mubr.msk.f32.gmra.mxu1 %vm265_vm0, %v2189_v22  ;;  %1786 = vmatprep.subr.mxu0 %v260_v44 }
  0x4b   : > { %1772 = vmatprep.mubr.msk.f32.mxu1 %vm265_vm0, %v2196_v24  ;;  %1787 = vmatpush3.msra.mxu0 %v260_v44 }
  0x4c   : > { %1788 = vmatprep.subr.mxu0 %v259_v45  ;;  %1872 = vmatpush3.msra.mxu1 %v240_v48 }
  0x4d   : > { %1789 = vmatpush3.msra.mxu0 %v259_v45  ;;  %1871 = vmatprep.subr.mxu1 %v239_v49 }
  0x4e   : > { %1773 = vmatmul.mubr.msk.f32.gmra.mxu1 %vm265_vm0, %v2211_v27  ;;  %1790 = vmatprep.subr.mxu0 %v258_v46 }
  0x4f   : > { %1775 = vmatprep.mubr.msk.f32.mxu1 %vm265_vm0, %v2218_v29  ;;  %1791 = vmatpush3.msra.mxu0 %v258_v46 }
  0x50   : > { %1792 = vmatprep.subr.mxu0 %v257_v47  ;;  %1873 = vmatpush3.msra.mxu1 %v239_v49 }
  0x51   : > { %1793 = vmatpush3.msra.mxu0 %v257_v47 }
  0x52   : > { %1776 = vmatmul.mubr.msk.f32.gmra.mxu1 %vm265_vm0, %v2233_v32  ;;  %1795 = vmatmul.mubr.msk.f32.vlgmr.msra.gmra.mxu0 %vm265_vm0, %v2163_v17 }
  0x53   : > { %1797 = vmatprep.mubr.msk.f32.mxu0 %vm265_vm0, %v2172_v19  ;;  %1806 = vmatprep.subr.mxu0 %v240_v48 }
  0x54   : > { %1807 = vmatpush3.msra.mxu0 %v240_v48 }
  0x55   : > { %1808 = vmatprep.subr.mxu0 %v239_v49 }
  0x56   : > { %1798 = vmatmul.mubr.msk.f32.gmra.mxu0 %vm265_vm0, %v2189_v22 }
  0x57   : > { %1800 = vmatprep.mubr.msk.f32.mxu0 %vm265_vm0, %v2196_v24  ;;  %1809 = vmatpush3.msra.mxu0 %v239_v49 }
  0x5a   : > { %1801 = vmatmul.mubr.msk.f32.gmra.mxu0 %vm265_vm0, %v2211_v27 }
  0x5b   : > { %1803 = vmatprep.mubr.msk.f32.mxu0 %vm265_vm0, %v2218_v29 }
  0x5e   : > { %1804 = vmatmul.mubr.msk.f32.gmra.mxu0 %vm265_vm0, %v2233_v32 }
  0xe8   : > { %v1684_v50 = vpop.f32.mrf.mxu0 }
  0xea   : > { %v356_v51 = vpop.f32.mrf.mxu0 }
  0xeb   : > { %1810 = vmatprep.mubr.msk.f32.mxu0 %vm815_vm1, %v356_v51  ;;  %v1712_v55 = vpop.f32.mrf.mxu1 }
  0xec   : > { %v1687_v52 = vpop.f32.mrf.mxu0  ;;  %1811 = vmatmul.mubr.msk.f32.vlgmr.msra.gmra.mxu0 %vm815_vm1, %v1684_v50 }
  0xed   : > { %v461_v58 = vpop.f32.mrf.mxu1 }
  0xee   : > { %v366_v53 = vpop.f32.mrf.mxu0 }
  0xef   : > { %1813 = vmatprep.mubr.msk.f32.mxu0 %vm815_vm1, %v366_v53 }
  0xf0   : > { %v1690_v54 = vpop.f32.mrf.mxu0  ;;  %1814 = vmatmul.mubr.msk.f32.gmra.mxu0 %vm815_vm1, %v1687_v52 }
  0xf2   : > { %v376_v56 = vpop.f32.mrf.mxu0 }
  0xf3   : > { %1816 = vmatprep.mubr.msk.f32.mxu0 %vm815_vm1, %v376_v56 }
  0xf4   : > { %v1693_v57 = vpop.f32.mrf.mxu0  ;;  %1817 = vmatmul.mubr.msk.f32.gmra.mxu0 %vm815_vm1, %v1690_v54 }
  0xf6   : > { %v386_v59 = vpop.f32.mrf.mxu0 }
  0xf7   : > { %1819 = vmatprep.mubr.msk.f32.mxu0 %vm815_vm1, %v386_v59  ;;  %v1715_v61 = vpop.f32.mrf.mxu1 }
  0xf8   : > { %v1740_v60 = vpop.f32.mrf.mxu0  ;;  %1820 = vmatmul.mubr.msk.f32.gmra.mxu0 %vm815_vm1, %v1693_v57 }
  0xf9   : > { %1822 = vmatprep.mubr.msk.f32.mxu0 %vm815_vm1, %v461_v58  ;;  %v471_v63 = vpop.f32.mrf.mxu1 }
  0xfa   : > { %v566_v62 = vpop.f32.mrf.mxu0 }
  0xfb   : > { %1834 = vmatprep.mubr.msk.f32.mxu1 %vm815_vm1, %v566_v62 }
  0xfc   : > { %v1743_v0 = vpop.f32.mrf.mxu0  ;;  %1823 = vmatmul.mubr.msk.f32.gmra.mxu0 %vm815_vm1, %v1712_v55  ;;  %1835 = vmatmul.mubr.msk.f32.vlgmr.msra.gmra.mxu1 %vm815_vm1, %v1740_v60  ;;  %v1718_v1 = vpop.f32.mrf.mxu1 }
  0xfd   : > { %1825 = vmatprep.mubr.msk.f32.mxu0 %vm815_vm1, %v471_v63 }
  0xfe   : > { %v576_v2 = vpop.f32.mrf.mxu0  ;;  %v481_v3 = vpop.f32.mrf.mxu1 }
  0xff   : > { %1837 = vmatprep.mubr.msk.f32.mxu1 %vm815_vm1, %v576_v2 }
 0x100   : > { %v1746_v4 = vpop.f32.mrf.mxu0  ;;  %1826 = vmatmul.mubr.msk.f32.gmra.mxu0 %vm815_vm1, %v1715_v61  ;;  %1838 = vmatmul.mubr.msk.f32.gmra.mxu1 %vm815_vm1, %v1743_v0 }
 0x101   : > { %1828 = vmatprep.mubr.msk.f32.mxu0 %vm815_vm1, %v481_v3  ;;  %v1721_v6 = vpop.f32.mrf.mxu1 }
 0x102   : > { %v586_v5 = vpop.f32.mrf.mxu0 }
 0x103   : > { %1840 = vmatprep.mubr.msk.f32.mxu1 %vm815_vm1, %v586_v5  ;;  %v491_v8 = vpop.f32.mrf.mxu1 }
 0x104   : > { %v1749_v7 = vpop.f32.mrf.mxu0  ;;  %1829 = vmatmul.mubr.msk.f32.gmra.mxu0 %vm815_vm1, %v1718_v1  ;;  %1841 = vmatmul.mubr.msk.f32.gmra.mxu1 %vm815_vm1, %v1746_v4 }
 0x105   : > { %1831 = vmatprep.mubr.msk.f32.mxu0 %vm815_vm1, %v491_v8 }
 0x106   : > { %v596_v9 = vpop.f32.mrf.mxu0  ;;  %v1768_v10 = vpop.f32.mrf.mxu1 }
 0x107   : > { %1843 = vmatprep.mubr.msk.f32.mxu1 %vm815_vm1, %v596_v9 }
 0x108   : > { %1832 = vmatmul.mubr.msk.f32.gmra.mxu0 %vm815_vm1, %v1721_v6  ;;  %1844 = vmatmul.mubr.msk.f32.gmra.mxu1 %vm815_vm1, %v1749_v7  ;;  %v671_v11 = vpop.f32.mrf.mxu1 }
 0x109   : > { %1846 = vmatprep.mubr.msk.f32.mxu1 %vm815_vm1, %v671_v11 }
 0x10a   : > { %v1771_v12 = vpop.f32.mrf.mxu1 }
 0x10c   : > { %1847 = vmatmul.mubr.msk.f32.gmra.mxu1 %vm815_vm1, %v1768_v10  ;;  %v681_v13 = vpop.f32.mrf.mxu1 }
 0x10d   : > { %1849 = vmatprep.mubr.msk.f32.mxu1 %vm815_vm1, %v681_v13 }
 0x10e   : > { %v1774_v14 = vpop.f32.mrf.mxu1 }
 0x110   : > { %1850 = vmatmul.mubr.msk.f32.gmra.mxu1 %vm815_vm1, %v1771_v12  ;;  %v691_v15 = vpop.f32.mrf.mxu1 }
 0x111   : > { %1852 = vmatprep.mubr.msk.f32.mxu1 %vm815_vm1, %v691_v15 }
 0x112   : > { %v1777_v16 = vpop.f32.mrf.mxu1  ;;  %v1796_v17 = vpop.f32.mrf.mxu0 }
 0x114   : > { %1853 = vmatmul.mubr.msk.f32.gmra.mxu1 %vm815_vm1, %v1774_v14  ;;  %v701_v18 = vpop.f32.mrf.mxu1  ;;  %v776_v19 = vpop.f32.mrf.mxu0 }
 0x115   : > { %1855 = vmatprep.mubr.msk.f32.mxu1 %vm815_vm1, %v701_v18 }
 0x116   : > { %v1799_v20 = vpop.f32.mrf.mxu0 }
 0x118   : > { %1856 = vmatmul.mubr.msk.f32.gmra.mxu1 %vm815_vm1, %v1777_v16  ;;  %v786_v21 = vpop.f32.mrf.mxu0 }
 0x119   : > { %1858 = vmatprep.mubr.msk.f32.mxu1 %vm815_vm1, %v776_v19 }
 0x11a   : > { %v1802_v22 = vpop.f32.mrf.mxu0 }
 0x11c   : > { %1859 = vmatmul.mubr.msk.f32.gmra.mxu1 %vm815_vm1, %v1796_v17  ;;  %v796_v23 = vpop.f32.mrf.mxu0 }
 0x11d   : > { %1861 = vmatprep.mubr.msk.f32.mxu1 %vm815_vm1, %v786_v21 }
 0x11e   : > { %v1805_v24 = vpop.f32.mrf.mxu0 }
 0x120   : > { %1862 = vmatmul.mubr.msk.f32.gmra.mxu1 %vm815_vm1, %v1799_v20  ;;  %v806_v25 = vpop.f32.mrf.mxu0 }
 0x121   : > { %1864 = vmatprep.mubr.msk.f32.mxu1 %vm815_vm1, %v796_v23 }
 0x124   : > { %1865 = vmatmul.mubr.msk.f32.gmra.mxu1 %vm815_vm1, %v1802_v22 }
 0x125   : > { %1867 = vmatprep.mubr.msk.f32.mxu1 %vm815_vm1, %v806_v25 }
 0x128   : > { %1868 = vmatmul.mubr.msk.f32.gmra.mxu1 %vm815_vm1, %v1805_v24 }
 0x1ac   : > { %v1812_v26 = vpop.f32.mrf.mxu0 }
 0x1ad   : > { %v1202_v48 = vmul.f32 %v1812_v26, %v1812_v26 }
 0x1ae   : > { %v1002_v27 = vpop.f32.mrf.mxu0 }
 0x1af   : > { %v1201_v50 = vmul.f32 %v1002_v27, %v1002_v27 }
 0x1b0   : > { %v2373_v28 = vpop.f32.mrf.mxu0 }
 0x1b1   : > { %v1204_v56 = vmul.f32 %v2373_v28, %v2373_v28 }
 0x1b2   : > { %v2375_v29 = vpop.f32.mrf.mxu0 }
 0x1b3   : > { %v1203_v57 = vmul.f32 %v2375_v29, %v2375_v29 }
 0x1b4   : > { %v2377_v30 = vpop.f32.mrf.mxu0 }
 0x1b5   : > { %v1206_v58 = vmul.f32 %v2377_v30, %v2377_v30 }
 0x1b6   : > { %v2379_v31 = vpop.f32.mrf.mxu0 }
 0x1b7   : > { %v1205_v60 = vmul.f32 %v2379_v31, %v2379_v31 }
 0x1b8   : > { %v2381_v32 = vpop.f32.mrf.mxu0 }
 0x1b9   : > { %v1208_v1 = vmul.f32 %v2381_v32, %v2381_v32 }
 0x1ba   : > { %v2383_v33 = vpop.f32.mrf.mxu0 }
 0x1bb   : > { %v2419_v2 = vmul.f32 %v2383_v33, %v2383_v33 }
 0x1bc   : > { %v1824_v34 = vpop.f32.mrf.mxu0  ;;  %v1836_v35 = vpop.f32.mrf.mxu1 }
 0x1bd   : > { %v1210_v44 = vmul.f32 %v1824_v34, %v1824_v34  ;;  %v2399_v51 = vmul.f32 %v1824_v34, %v1812_v26  ;;  %v1226_v61 = vsub.f32 %v1836_v35, %v1202_v48 }
 0x1be   : > { %v1042_v36 = vpop.f32.mrf.mxu0  ;;  %v1082_v37 = vpop.f32.mrf.mxu1 }
 0x1bf   : > { %v1209_v47 = vmul.f32 %v1042_v36, %v1042_v36  ;;  %v1290_v52 = vadd.f32 %v1210_v44, %v1202_v48  ;;  %v1225_v3 = vsub.f32 %v1082_v37, %v1201_v50  ;;  %v2422_v5 = vmul.f32 2.0, %v2399_v51 }
 0x1c0   : > { %v2385_v38 = vpop.f32.mrf.mxu0  ;;  %v1839_v39 = vpop.f32.mrf.mxu1  ;;  %v2430_v24 = vmul.f32 %v1042_v36, %v1002_v27 }
 0x1c1   : > { %v1212_v53 = vmul.f32 %v2385_v38, %v2385_v38  ;;  %v1289_v59 = vadd.f32 %v1209_v47, %v1201_v50  ;;  %v1298_v6 = vadd.f32 0.0001, %v1290_v52  ;;  %v1228_v12 = vsub.f32 %v1839_v39, %v1204_v56 }
 0x1c2   : > { %v1092_v40 = vpop.f32.mrf.mxu1  ;;  %v2387_v41 = vpop.f32.mrf.mxu0 }
 0x1c3   : > { %v1211_v62 = vmul.f32 %v2387_v41, %v2387_v41  ;;  %v1292_v7 = vadd.f32 %v1212_v53, %v1204_v56  ;;  %v1297_v11 = vadd.f32 0.0001, %v1289_v59  ;;  %v1227_v16 = vsub.f32 %v1092_v40, %v1203_v57 }
 0x1c4   : > { %v2389_v42 = vpop.f32.mrf.mxu1  ;;  %v2393_v45 = vpop.f32.mrf.mxu0 }
 0x1c5   : > { %v1291_v15 = vadd.f32 %v1211_v62, %v1203_v57  ;;  %v1214_v17 = vmul.f32 %v2393_v45, %v2393_v45  ;;  %v1300_v25 = vadd.f32 0.0001, %v1292_v7  ;;  %v1230_v26 = vsub.f32 %v2389_v42, %v1206_v58 }
 0x1c6   : > { %v2391_v43 = vpop.f32.mrf.mxu1  ;;  %v2403_v54 = vpop.f32.mrf.mxu0 }
 0x1c7   : > { %v1213_v20 = vmul.f32 %v2403_v54, %v2403_v54  ;;  %v1299_v48 = vadd.f32 0.0001, %v1291_v15  ;;  %v1294_v50 = vadd.f32 %v1214_v17, %v1206_v58  ;;  %v1229_v52 = vsub.f32 %v2391_v43, %v1205_v60 }
 0x1c8   : > { %v2395_v46 = vpop.f32.mrf.mxu1  ;;  %v2424_v8 = vpop.f32.mrf.mxu0 }
 0x1c9   : > { %v1293_v36 = vadd.f32 %v1213_v20, %v1205_v60  ;;  %v1232_v57 = vsub.f32 %v2395_v46, %v1208_v1  ;;  %v1220_v60 = vmul.f32 %v2385_v38, %v2373_v28 }
 0x1ca   : > { %v2397_v49 = vpop.f32.mrf.mxu1  ;;  %v2433_v34 = vpop.f32.mrf.mxu0 }
 0x1cb   : > { %v1215_v42 = vmul.f32 %v2433_v34, %v2433_v34  ;;  %v1231_v46 = vsub.f32 %v2397_v49, %v2419_v2  ;;  %v1252_v38 = vmul.f32 2.0, %v1220_v60 }
 0x1cc   : > { %v1848_v55 = vpop.f32.mrf.mxu1 }
 0x1cd   : > { %v1234_v63 = vsub.f32 %v1848_v55, %v1210_v44  ;;  %v1295_v7 = vadd.f32 %v1215_v42, %v2419_v2 }
 0x1ce   : > { %v1122_v0 = vpop.f32.mrf.mxu1 }
 0x1cf   : > { %v1233_v4 = vsub.f32 %v1122_v0, %v1209_v47  ;;  %v1306_v9 = vadd.f32 %v1234_v63, %v1226_v61  ;;  %v1249_v0 = vmul.f32 2.0, %v2430_v24  ;;  %v1303_v49 = vadd.f32 0.0001, %v1295_v7 }
 0x1d0   : > { %v1851_v10 = vpop.f32.mrf.mxu1 }
 0x1d1   : > { %v1305_v13 = vadd.f32 %v1233_v4, %v1225_v3  ;;  %v1236_v14 = vsub.f32 %v1851_v10, %v1212_v53  ;;  %v1314_v18 = vadd.f32 0.0009, %v1306_v9  ;;  %v1216_v53 = vmul.f32 %v2424_v8, %v2424_v8 }
 0x1d2   : > { %v1132_v19 = vpop.f32.mrf.mxu1  ;;  %v1302_v3 = vadd.f32 0.0001, %v1294_v50 }
 0x1d3   : > { %v1313_v21 = vadd.f32 0.0009, %v1305_v13  ;;  %v1308_v22 = vadd.f32 %v1236_v14, %v1228_v12  ;;  %v1235_v23 = vsub.f32 %v1132_v19, %v1211_v62  ;;  %v1322_v35 = vmul.f32 %v1314_v18, %v1298_v6 }
 0x1d4   : > { %v1854_v37 = vpop.f32.mrf.mxu1  ;;  %v1296_v12 = vadd.f32 %v1216_v53, %v1208_v1 }
 0x1d5   : > { %v1321_v39 = vmul.f32 %v1313_v21, %v1297_v11  ;;  %v1316_v40 = vadd.f32 0.0009, %v1308_v22  ;;  %v1307_v44 = vadd.f32 %v1235_v23, %v1227_v16  ;;  %v1238_v47 = vsub.f32 %v1854_v37, %v1214_v17 }
 0x1d6   : > { %v1142_v27 = vpop.f32.mrf.mxu1  ;;  %1915 = vrcp.f32 %v1322_v35  ;;  %v1301_v11 = vadd.f32 0.0001, %v1293_v36  ;;  %v1219_v17 = vmul.f32 %v2387_v41, %v2375_v29  ;;  %v1258_v22 = vadd.f32 0.0001, %v2422_v5 }
 0x1d7   : > { %v1315_v55 = vadd.f32 0.0009, %v1307_v44  ;;  %v1310_v56 = vadd.f32 %v1238_v47, %v1230_v26  ;;  %v1324_v59 = vmul.f32 %v1316_v40, %v1300_v25  ;;  %v1237_v61 = vsub.f32 %v1142_v27, %v1213_v20 }
 0x1d8   : > { %v1857_v62 = vpop.f32.mrf.mxu1  ;;  %1917 = vrcp.f32 %v1321_v39  ;;  %v1257_v23 = vadd.f32 0.0001, %v1249_v0  ;;  %v1222_v25 = vmul.f32 %v2393_v45, %v2377_v30  ;;  %v1304_v26 = vadd.f32 0.0001, %v1296_v12 }
 0x1d9   : > { %v1323_v58 = vmul.f32 %v1315_v55, %v1299_v48  ;;  %v1318_v63 = vadd.f32 0.0009, %v1310_v56  ;;  %v1240_v43 = vsub.f32 %v1857_v62, %v1216_v53  ;;  %v1309_v4 = vadd.f32 %v1237_v61, %v1229_v52 }
 0x1da   : > { %v1152_v6 = vpop.f32.mrf.mxu1  ;;  %1919 = vrcp.f32 %v1324_v59  ;;  %v1251_v41 = vmul.f32 2.0, %v1219_v17  ;;  %v1260_v47 = vadd.f32 0.0001, %v1252_v38  ;;  %v1254_v5 = vmul.f32 2.0, %v1222_v25 }
 0x1db   : > { %v1312_v9 = vadd.f32 %v1240_v43, %v1232_v57  ;;  %v1239_v10 = vsub.f32 %v1152_v6, %v1215_v42  ;;  %v1317_v13 = vadd.f32 0.0009, %v1309_v4  ;;  %1921 = vrcp.f32 %v1323_v58 }
 0x1dc   : > { %v1860_v14 = vpop.f32.mrf.mxu1  ;;  %v1326_v15 = vmul.f32 %v1318_v63, %v1302_v3  ;;  %v1221_v52 = vmul.f32 %v2403_v54, %v2379_v31  ;;  %v1224_v30 = vmul.f32 %v2424_v8, %v2381_v32  ;;  %v1223_v57 = vmul.f32 %v2433_v34, %v2383_v33 }
 0x1dd   : > { %v1311_v16 = vadd.f32 %v1239_v10, %v1231_v46  ;;  %v1242_v28 = vsub.f32 %v1860_v14, %v2399_v51  ;;  %v1325_v18 = vmul.f32 %v1317_v13, %v1301_v11  ;;  %v1320_v19 = vadd.f32 0.0009, %v1312_v9 }
 0x1de   : > { %v1162_v20 = vpop.f32.mrf.mxu1  ;;  %1923 = vrcp.f32 %v1326_v15  ;;  %v1259_v58 = vadd.f32 0.0001, %v1251_v41  ;;  %v1262_v32 = vadd.f32 0.0001, %v1254_v5  ;;  %v1253_v8 = vmul.f32 2.0, %v1221_v52 }
 0x1df   : > { %v1319_v2 = vadd.f32 0.0009, %v1311_v16  ;;  %v1266_v21 = vmul.f32 2.0, %v1242_v28  ;;  %v1241_v1 = vsub.f32 %v1162_v20, %v2430_v24  ;;  %1925 = vrcp.f32 %v1325_v18 }
 0x1e0   : > { %v1863_v51 = vpop.f32.mrf.mxu1  ;;  %v1328_v39 = vmul.f32 %v1320_v19, %v1304_v26  ;;  %v1256_v34 = vmul.f32 2.0, %v1224_v30  ;;  %v1255_v9 = vmul.f32 2.0, %v1223_v57  ;;  %v1261_v28 = vadd.f32 0.0001, %v1253_v8 }
 0x1e1   : > { %v1327_v35 = vmul.f32 %v1319_v2, %v1303_v49  ;;  %v1274_v37 = vadd.f32 0.0009, %v1266_v21  ;;  %v1265_v29 = vmul.f32 2.0, %v1241_v1  ;;  %v1244_v40 = vsub.f32 %v1863_v51, %v1220_v60 }
 0x1e2   : > { %v1172_v44 = vpop.f32.mrf.mxu1  ;;  %v1264_v21 = vadd.f32 0.0001, %v1256_v34 }
 0x1e3   : > { %v1282_v48 = vmul.f32 %v1274_v37, %v1258_v22  ;;  %v1273_v24 = vadd.f32 0.0009, %v1265_v29  ;;  %v1243_v50 = vsub.f32 %v1172_v44, %v1219_v17  ;;  %v1268_v45 = vmul.f32 2.0, %v1244_v40  ;;  %v1916_v27 = vpop.eup %1915 }
 0x1e4   : > { %v1866_v53 = vpop.f32.mrf.mxu1  ;;  %1927 = vrcp.f32 %v1327_v35 }
 0x1e5   : > { %v1281_v36 = vmul.f32 %v1273_v24, %v1257_v23  ;;  %v1267_v42 = vmul.f32 2.0, %v1243_v50  ;;  %v1246_v55 = vsub.f32 %v1866_v53, %v1222_v25  ;;  %v1918_v56 = vpop.eup %1917  ;;  %1929 = vrcp.f32 %v1328_v39 }
 0x1e6   : > { %v1338_v59 = vmul.f32 %v1916_v27, %v1282_v48  ;;  %v1276_v61 = vadd.f32 0.0009, %v1268_v45  ;;  %v1182_v62 = vpop.f32.mrf.mxu1  ;;  %v1263_v25 = vadd.f32 0.0001, %v1255_v9 }
 0x1e7   : > { %v1337_v31 = vmul.f32 %v1918_v56, %v1281_v36  ;;  %v1275_v54 = vadd.f32 0.0009, %v1267_v42  ;;  %v1270_v63 = vmul.f32 2.0, %v1246_v55  ;;  %v1245_v0 = vsub.f32 %v1182_v62, %v1221_v52  ;;  %v1920_v3 = vpop.eup %1919 }
 0x1e8   : > { %v1284_v43 = vmul.f32 %v1276_v61, %v1260_v47  ;;  %v1869_v60 = vpop.f32.mrf.mxu1  ;;  %v1922_v33 = vpop.eup %1921  ;;  %v1346_v10 = vsel %vm815_vm1, %v1338_v59, 0.0 }
 0x1e9   : > { %v1345_v4 = vsel %vm815_vm1, %v1337_v31, 0.0  ;;  %v1283_v6 = vmul.f32 %v1275_v54, %v1259_v58  ;;  %v1278_v7 = vadd.f32 0.0009, %v1270_v63  ;;  %v1248_v46 = vsub.f32 %v1869_v60, %v1224_v30 }
 0x1ea   : > { %v1269_v11 = vmul.f32 2.0, %v1245_v0  ;;  %v1192_v12 = vpop.f32.mrf.mxu1  ;;  %v1340_v13 = vmul.f32 %v1920_v3, %v1284_v43  ;;  %v1347_v38 = vadd.f32 %v1346_v10, %v1345_v4 }
 0x1eb   : > { %v1339_v14 = vmul.f32 %v1922_v33, %v1283_v6  ;;  %v1272_v15 = vmul.f32 2.0, %v1248_v46  ;;  %v1247_v16 = vsub.f32 %v1192_v12, %v1223_v57  ;;  %v1286_v17 = vmul.f32 %v1278_v7, %v1262_v32  ;;  %v1924_v2 = vpop.eup %1923 }
 0x1ec   : > { %v1277_v18 = vadd.f32 0.0009, %v1269_v11  ;;  %v1926_v23 = vpop.eup %1925  ;;  %v1350_v26 = vsel %vm815_vm1, %v1340_v13, 0.0 }
 0x1ed   : > { %v1348_v19 = vsel %vm815_vm1, %v1339_v14, 0.0  ;;  %v1280_v20 = vadd.f32 0.0009, %v1272_v15  ;;  %v1271_v49 = vmul.f32 2.0, %v1247_v16  ;;  %v1342_v35 = vmul.f32 %v1924_v2, %v1286_v17 }
 0x1ee   : > { %v1349_v1 = vadd.f32 %v1348_v19, %v1347_v38  ;;  %v1285_v22 = vmul.f32 %v1277_v18, %v1261_v28 }
 0x1ef   : > { %v1279_v51 = vadd.f32 0.0009, %v1271_v49  ;;  %v1288_v29 = vmul.f32 %v1280_v20, %v1264_v21  ;;  %v1354_v5 = vsel %vm815_vm1, %v1342_v35, 0.0 }
 0x1f0   : > { %v1341_v37 = vmul.f32 %v1926_v23, %v1285_v22  ;;  %v1351_v41 = vadd.f32 %v1350_v26, %v1349_v1 }
 0x1f1   : > { %v1287_v39 = vmul.f32 %v1279_v51, %v1263_v25  ;;  %v1928_v40 = vpop.eup %1927 }
 0x1f2   : > { %v1352_v44 = vsel %vm815_vm1, %v1341_v37, 0.0  ;;  %v1930_v47 = vpop.eup %1929 }
 0x1f3   : > { %v1343_v48 = vmul.f32 %v1928_v40, %v1287_v39  ;;  %v1353_v24 = vadd.f32 %v1352_v44, %v1351_v41  ;;  %v1344_v50 = vmul.f32 %v1930_v47, %v1288_v29 }
 0x1f5   : > { %v1355_v52 = vadd.f32 %v1354_v5, %v1353_v24  ;;  %v1356_v30 = vsel %vm815_vm1, %v1343_v48, 0.0  ;;  %v1358_v53 = vsel %vm815_vm1, %v1344_v50, 0.0 }
 0x1f7   : > { %v1357_v45 = vadd.f32 %v1356_v30, %v1355_v52 }
 0x1f9   : > { %v1359_v27 = vadd.f32 %v1358_v53, %v1357_v45 }
 0x1fb   : > { %1360 = vadd.xlane.f32.xlu0 %v1359_v27 }
 0x284   : > { %v1361_v36 = vpop.xlane.xlu0 %1360 }
 0x285   : > { %v1362_v42 = vrot.slane %v1361_v36, 4 }
 0x287   : > { %v1363_v55 = vadd.f32 %v1362_v42, %v1361_v36 }
 0x289   : > { %v1364_v56 = vrot.slane %v1363_v55, 2 }
 0x28b   : > { %v1365_v57 = vadd.f32 %v1364_v56, %v1363_v55 }
 0x28d   : > { %v1366_v59 = vrot.slane %v1365_v57, 1 }
 0x28f   : > { %v1367_v61 = vadd.f32 %v1366_v59, %v1365_v57 }
 0x291   : > { %1874 = vpush %v1367_v61 }
 0x2c2   : > { %s1875_s22 = spop %1874 }
 0x2c3   : > { %v1369_v62 = vstv %s1875_s22 }
 0x2c4   : > { %1370 = vst [vmem:[%s204_s13] sm:$0x1] %v1369_v62 }
 0x2c5   : > { %1944 = shalt.err (!%p1941_p3)
}
 0x2c6   : > { %s1945_s7 = scalar_lea.hbm %s1382_s28, 16  ;;  %s1949_s10 = scalar_lea.hbm %s2512_s4, 32 }
 0x2c7   : > { %p1946_p4 = scmp.ne.s32.totalorder %s1382_s28, %s1945_s7  ;;  %p1950_p9 = scmp.lt.s32.totalorder %s1382_s28, %s2512_s4 }
 0x2c8   : > { %p1951_p10 = scmp.lt.s32.totalorder %s1949_s10, %s1945_s7 }
 0x2c9   : > { %p1947_p7 = pnand %p1946_p4, %p2057_p5 }
 0x2ca   : > { %p1952_p11 = por %p1951_p10, %p1950_p9 }
 0x2cb   : > { %p1948_p8 = pneg %p1947_p7 }
 0x2cd   : > { %p1953_p12 = pnand %p1952_p11, %p1948_p8 }
 0x2cf   : > { %1956 = shalt.err (!%p1953_p12)
}
 0x2d0   : > { %1876 = dma.vmem_to_hbm [thread:$0]  (%p2057_p5), %s2470_s14, 16, %s1382_s28, %s1372_s29  }
 0x2d1 PF: > { %p1882_p13 = scmp.ge.s32.totalorder %s1991_s18, 2  ;;  %s1396_s13 = sand.u32 1, %s1979_s15  }
 0x2d2   : > { %s1397_s20 = scalar_lea.sflag [#allocation3], %s1396_s13 }
 0x2d3   : > { %p1879_p0 = pnand %p1882_p13, %p2061_p6 }
 0x2d5   : > { %p1880_p1 = pneg %p1879_p0 }
 0x2d7   : > { %1974 = dma.done.wait (%p1880_p1), %s1397_s20, 16  }
 0x2d8   : > { %1976 = vsyncadd (%p1880_p1), %s1397_s20, 4294967280  ;;  %p14_p2 = scmp.ge.s32.totalorder %s2044_s21, 4   ;;  %s2515_s15 = smov %s1983_s16 }
 0x2d9   : > { %s2516_s16 = smov %s1987_s17  ;;  %s2517_s17 = smov %s2055_s24 }
 0x2da   : > { %s2518_s18 = smov %s2044_s21  ;;  %16 = sbr.rel (!%p14_p2) target bundleno = 3 (0x3), region = 74 }
 0x2df   :  { %1401 = vsyncpa [#allocation3], 1 }
 0x2e0   :  { %1403 = vsyncpa [#allocation3 + $0x1], 1 }

</bundles_post_ra>
